<compile_context>
chip_gen: v5e
topology: v5e:2x2
jax: 0.10.0
libtpu: 0.0.40
codegen_flags: <defaults>
</compile_context>

<pallas_src>
import functools

import jax
import jax.numpy as jnp
from jax.experimental import pallas as pl
from jax.experimental.pallas import tpu as pltpu

_ACC_LANES = 128  # lanes in the resident partial-sum accumulator


def _contrastive_loss_kernel(o1_ref, o2_ref, lbl_ref, out_ref, *,
                             margin, batch, block_rows, blocks_per_partial):
    c = pl.program_id(0)   # partial ("core") axis      -> parallel
    t = pl.program_id(1)   # row-block reduction axis   -> arbitrary

    # Init the resident per-partial accumulator at the start of the reduction.
    @pl.when(t == 0)
    def _():
        out_ref[...] = jnp.zeros_like(out_ref)

    # In-kernel cast: HBM traffic stays at the input dtype (e.g. bf16),
    # all arithmetic is f32.
    o1 = o1_ref[...].astype(jnp.float32)          # (TB, D)
    o2 = o2_ref[...].astype(jnp.float32)          # (TB, D)
    lbl = lbl_ref[...].astype(jnp.float32)        # (1, TB)  lane-dense

    diff = o1 - o2
    d2 = jnp.sum(diff * diff, axis=1, keepdims=True)   # (TB, 1)  XLU reduce
    d = jnp.sqrt(d2)                                    # EUP
    hinge = jnp.maximum(margin - d, 0.0)
    h2 = hinge * hinge

    # block_id is intentionally *unclamped* (the DMA index_map clamps), so
    # duplicated / ragged-tail blocks mask to zero.
    block_id = c * blocks_per_partial + t
    row0 = block_id * block_rows

    # Select-based masking BEFORE any cross-row reduction (drops NaN/Inf in
    # discarded rows; never use a multiplicative mask here).
    row_col = jax.lax.broadcasted_iota(jnp.int32, d2.shape, 0) + row0   # (TB,1)
    valid_col = row_col < batch
    d2_m = jnp.where(valid_col, d2, 0.0)
    h2_m = jnp.where(valid_col, h2, 0.0)

    row_lane = jax.lax.broadcasted_iota(jnp.int32, lbl.shape, 1) + row0  # (1,TB)
    lbl_m = jnp.where(row_lane < batch, lbl, 0.0)

    # label*d2 + (1-label)*h2 == label*(d2 - h2) + h2.
    # Label-weighted term as a (1,TB)@(TB,1) dot on the otherwise idle MXU,
    # keeping the label lane-dense (no transpose / no padded column buffers).
    weighted = jnp.dot(lbl_m, d2_m - h2_m,
                       preferred_element_type=jnp.float32)               # (1,1)
    tile_sum = weighted[0, 0] + jnp.sum(h2_m)

    # Round-robin the per-tile sums across the accumulator's 128 lanes:
    # shallower sequential f32 accumulation for very large B, lane-dense store.
    lane = jax.lax.broadcasted_iota(jnp.int32, out_ref.shape, 2)
    out_ref[...] += jnp.where(lane == (t % _ACC_LANES), tile_sum, 0.0)


def _num_tensorcores_per_chip():
    """Best-effort core count: v7x exposes 2 TensorCores per chip, v5e/v6e 1."""
    try:
        kind = (getattr(jax.devices()[0], "device_kind", "") or "").lower()
        if "7" in kind:
            return 2
    except Exception:
        pass
    return 1


def contrastive_loss(output1, output2, label, margin=5.0, *,
                     block_rows=None, num_partials=None):
    """Pallas TPU version of ContrastiveLoss(margin).forward(output1, output2, label)."""
    output1 = jnp.asarray(output1)
    output2 = jnp.asarray(output2)
    B, D = output1.shape

    # Lane-dense label, native dtype (cast happens in-kernel); only promote
    # bool / integer labels, which have no useful narrow layout here.
    lbl = jnp.asarray(label).reshape(1, B)
    if not jnp.issubdtype(lbl.dtype, jnp.floating):
        lbl = lbl.astype(jnp.float32)

    itemsize = output1.dtype.itemsize
    lbl_itemsize = lbl.dtype.itemsize
    d_pad = -(-D // 128) * 128                      # lane-padded feature width

    # --- VMEM budget (per generation) ---------------------------------------
    try:
        vmem_cap = int(pltpu.get_tpu_info().vmem_capacity_bytes)
    except Exception:
        vmem_cap = 64 * 1024 * 1024
    budget = min((vmem_cap * 3) // 4, 64 * 1024 * 1024)   # v7x ~48 MiB, v5e/v6e 64 MiB

    # --- tile sizing in VMEM bytes per batch row -----------------------------
    # 2 inputs x 2 pipeline buffers (native dtype, lane padded)
    # + ~3 f32 temporaries (cast/diff/square chain)
    # + lane-dense label (sublane-padded to 8, double buffered).
    if block_rows is None:
        per_row = 4 * d_pad * itemsize + 3 * d_pad * 4 + 2 * 8 * lbl_itemsize
        tb = (budget - (2 << 20)) // per_row
        tb = max(128, (tb // 128) * 128)
    else:
        tb = int(block_rows)

    if tb >= B:
        tb = B                                   # single full-array block
    else:
        tb = max(128, (tb // 128) * 128)         # (1, tb) label block: lanes % 128 == 0
        if tb >= B:
            tb = B

    num_blocks = -(-B // tb)                     # ceil-div
    cores = _num_tensorcores_per_chip() if num_partials is None else int(num_partials)
    num_partials_eff = 2 if (cores >= 2 and num_blocks >= 2) else 1
    bpp = -(-num_blocks // num_partials_eff)     # row blocks per partial

    def in_map(c, t):
        # Clamp so we never DMA a fully out-of-range block; duplicated rows
        # are masked to zero inside the kernel (block_id there is unclamped).
        return (jnp.minimum(c * bpp + t, num_blocks - 1), 0)

    def lbl_map(c, t):
        return (0, jnp.minimum(c * bpp + t, num_blocks - 1))

    # --- explicit scoped-VMEM limit ------------------------------------------
    tb_pad = -(-tb // 128) * 128
    usage = (4 * tb * d_pad * itemsize              # 2 inputs x 2 buffers
             + 2 * 8 * tb_pad * lbl_itemsize        # label, double buffered
             + 3 * tb * d_pad * 4                   # f32 temporaries
             + (2 << 20))                           # out / semaphores / misc headroom
    vmem_limit = int(min(max(budget, usage), (vmem_cap * 9) // 10))

    kernel = functools.partial(
        _contrastive_loss_kernel,
        margin=float(margin),
        batch=B,
        block_rows=tb,
        blocks_per_partial=bpp,
    )

    partials = pl.pallas_call(
        kernel,
        # Block (1, 1, 128): last two dims equal the full array dims / are a
        # multiple of 128, so the (8,128) layout constraint is satisfied.
        out_shape=jax.ShapeDtypeStruct((num_partials_eff, 1, _ACC_LANES), jnp.float32),
        grid=(num_partials_eff, bpp),
        in_specs=[
            pl.BlockSpec((tb, D), in_map),
            pl.BlockSpec((tb, D), in_map),
            pl.BlockSpec((1, tb), lbl_map),
        ],
        out_specs=pl.BlockSpec((1, 1, _ACC_LANES), lambda c, t: (c, 0, 0)),
        compiler_params=pltpu.CompilerParams(
            dimension_semantics=("parallel", "arbitrary"),
            vmem_limit_bytes=vmem_limit),
    )(output1, output2, lbl)

    return jnp.sum(partials) * (1.0 / B)


def _reference_loss(output1, output2, label, margin=5.0):
    # Pure-JAX reference mirroring the PyTorch module exactly.
    o1 = jnp.asarray(output1).astype(jnp.float32)
    o2 = jnp.asarray(output2).astype(jnp.float32)
    lbl = jnp.asarray(label).astype(jnp.float32).reshape(-1)
    d2 = jnp.sum((o1 - o2) ** 2, axis=1)
    hinge = jnp.maximum(margin - jnp.sqrt(d2), 0.0)
    return jnp.mean(lbl * d2 + (1.0 - lbl) * hinge ** 2)


if __name__ == "__main__":
    key = jax.random.PRNGKey(0)
    k1, k2, k3 = jax.random.split(key, 3)

    # --- small default-path test (single full block) -------------------------
    B, D = 8, 32
    output1 = jax.random.normal(k1, (B, D), dtype=jnp.float32)
    output2 = jax.random.normal(k2, (B, D), dtype=jnp.float32)
    label = jax.random.bernoulli(k3, p=0.5, shape=(B,)).astype(jnp.float32)

    loss = jax.block_until_ready(contrastive_loss(output1, output2, label, margin=5.0))
    ref = jax.block_until_ready(_reference_loss(output1, output2, label, margin=5.0))
    assert jnp.allclose(loss, ref, rtol=1e-5, atol=1e-5), (loss, ref)

    # --- tiled path: ragged tail + forced 2 partials + masked duplicate block -
    B2, D2 = 300, 32
    o1b = jax.random.normal(k1, (B2, D2), dtype=jnp.float32)
    o2b = jax.random.normal(k2, (B2, D2), dtype=jnp.float32)
    lblb = jax.random.bernoulli(k3, p=0.5, shape=(B2,)).astype(jnp.float32)

    loss2 = jax.block_until_ready(
        contrastive_loss(o1b, o2b, lblb, margin=5.0, block_rows=128, num_partials=2))
    ref2 = jax.block_until_ready(_reference_loss(o1b, o2b, lblb, margin=5.0))
    assert jnp.allclose(loss2, ref2, rtol=1e-5, atol=1e-5), (loss2, ref2)

    # --- bf16 inputs: in-kernel cast path, single-partial tiled sweep ---------
    o1c = o1b.astype(jnp.bfloat16)
    o2c = o2b.astype(jnp.bfloat16)
    loss3 = jax.block_until_ready(
        contrastive_loss(o1c, o2c, lblb, margin=5.0, block_rows=128, num_partials=1))
    ref3 = jax.block_until_ready(_reference_loss(o1c, o2c, lblb, margin=5.0))
    assert jnp.allclose(loss3, ref3, rtol=1e-4, atol=1e-4), (loss3, ref3)

    print("KERNEL_OK")
</pallas_src>

<mosaic_0001>
module attributes {stable_mosaic.version = 11 : i64} {
  func.func @_contrastive_loss_kernel(%arg0: i32, %arg1: i32, %arg2: memref<8x32xf32, #tpu.memory_space<vmem>>, %arg3: memref<8x32xf32, #tpu.memory_space<vmem>>, %arg4: memref<1x8xf32, #tpu.memory_space<vmem>>, %arg5: memref<1x1x128xf32, #tpu.memory_space<vmem>>) attributes {dimension_semantics = [#tpu.dimension_semantics<parallel>, #tpu.dimension_semantics<arbitrary>], iteration_bounds = array<i64: 1, 1>, scalar_prefetch = 0 : i64, scratch_operands = 0 : i64, tpu.core_type = #tpu.core_type<tc>, window_params = [{transform_indices = @transform_0, window_bounds = array<i64: 8, 32>}, {transform_indices = @transform_1, window_bounds = array<i64: 8, 32>}, {transform_indices = @transform_2, window_bounds = array<i64: 1, 8>}, {transform_indices = @transform_3, window_bounds = array<i64: 1, 1, 128>}]} {
    %c0_i32 = arith.constant 0 : i32
    %0 = arith.cmpi eq, %arg1, %c0_i32 : i32
    %1 = arith.extui %0 : i1 to i32
    %c0_i32_0 = arith.constant 0 : i32
    %2 = arith.cmpi ne, %1, %c0_i32_0 : i32
    scf.if %2 {
      %cst_27 = arith.constant 0.000000e+00 : f32
      %62 = vector.broadcast %cst_27 : f32 to vector<1x1x128xf32>
      %c0_28 = arith.constant 0 : index
      %c0_29 = arith.constant 0 : index
      %c0_30 = arith.constant 0 : index
      %63 = vector.load %arg5[%c0_28, %c0_29, %c0_30] : memref<1x1x128xf32, #tpu.memory_space<vmem>>, vector<1x1x128xf32>
      tpu.vector_store %arg5[%c0_28, %c0_29, %c0_30], %62 {strides = array<i32>} : memref<1x1x128xf32, #tpu.memory_space<vmem>>, vector<1x1x128xf32>,
    } else {
    }
    %c0 = arith.constant 0 : index
    %c0_1 = arith.constant 0 : index
    %3 = vector.load %arg2[%c0, %c0_1] : memref<8x32xf32, #tpu.memory_space<vmem>>, vector<8x32xf32>
    %c0_2 = arith.constant 0 : index
    %c0_3 = arith.constant 0 : index
    %4 = vector.load %arg3[%c0_2, %c0_3] : memref<8x32xf32, #tpu.memory_space<vmem>>, vector<8x32xf32>
    %c0_4 = arith.constant 0 : index
    %c0_5 = arith.constant 0 : index
    %5 = vector.load %arg4[%c0_4, %c0_5] : memref<1x8xf32, #tpu.memory_space<vmem>>, vector<1x8xf32>
    %6 = arith.subf %3, %4 : vector<8x32xf32>
    %7 = arith.mulf %6, %6 : vector<8x32xf32>
    %cst = arith.constant dense<0.000000e+00> : vector<8xf32>
    %8 = vector.multi_reduction <add>, %7, %cst [1] : vector<8x32xf32> to vector<8xf32>
    %9 = vector.shape_cast %8 : vector<8xf32> to vector<8x1xf32>
    %10 = math.sqrt %9 : vector<8x1xf32>
    %cst_6 = arith.constant 5.000000e+00 : f32
    %11 = vector.broadcast %cst_6 : f32 to vector<8x1xf32>
    %12 = arith.subf %11, %10 : vector<8x1xf32>
    %cst_7 = arith.constant 0.000000e+00 : f32
    %13 = vector.broadcast %cst_7 : f32 to vector<8x1xf32>
    %14 = arith.maximumf %12, %13 : vector<8x1xf32>
    %15 = arith.mulf %14, %14 : vector<8x1xf32>
    %c1_i32 = arith.constant 1 : i32
    %16 = arith.muli %arg0, %c1_i32 : i32
    %17 = arith.addi %16, %arg1 : i32
    %c8_i32 = arith.constant 8 : i32
    %18 = arith.muli %17, %c8_i32 : i32
    %19 = tpu.iota {dimensions = array<i32: 0>} : vector<8x1xi32>
    %20 = vector.broadcast %18 : i32 to vector<8x1xi32>
    %21 = arith.addi %19, %20 : vector<8x1xi32>
    %c8_i32_8 = arith.constant 8 : i32
    %22 = vector.broadcast %c8_i32_8 : i32 to vector<8x1xi32>
    %23 = arith.cmpi slt, %21, %22 : vector<8x1xi32>
    %cst_9 = arith.constant 0.000000e+00 : f32
    %24 = vector.broadcast %cst_9 : f32 to vector<8x1xf32>
    %25 = arith.select %23, %9, %24 : vector<8x1xi1>, vector<8x1xf32>
    %cst_10 = arith.constant 0.000000e+00 : f32
    %26 = vector.broadcast %cst_10 : f32 to vector<8x1xf32>
    %27 = arith.select %23, %15, %26 : vector<8x1xi1>, vector<8x1xf32>
    %28 = tpu.iota {dimensions = array<i32: 1>} : vector<1x8xi32>
    %29 = vector.broadcast %18 : i32 to vector<1x8xi32>
    %30 = arith.addi %28, %29 : vector<1x8xi32>
    %c8_i32_11 = arith.constant 8 : i32
    %31 = vector.broadcast %c8_i32_11 : i32 to vector<1x8xi32>
    %32 = arith.cmpi slt, %30, %31 : vector<1x8xi32>
    %cst_12 = arith.constant 0.000000e+00 : f32
    %33 = vector.broadcast %cst_12 : f32 to vector<1x8xf32>
    %34 = arith.select %32, %5, %33 : vector<1x8xi1>, vector<1x8xf32>
    %35 = arith.subf %25, %27 : vector<8x1xf32>
    %cst_13 = arith.constant dense<0.000000e+00> : vector<1x1xf32>
    %36 = tpu.matmul %34, %35, %cst_13 {dimension_numbers = #tpu.dot_dimension_numbers<[1], [0], [0], [1], [0, 0, 1, 1], [], []>} : vector<1x8xf32>, vector<8x1xf32>, vector<1x1xf32> -> vector<1x1xf32>
    %37 = vector.extract %36[0, 0] : f32 from vector<1x1xf32>
    %38 = vector.shape_cast %27 : vector<8x1xf32> to vector<1x8x1xf32>
    %cst_14 = arith.constant dense<0.000000e+00> : vector<1xf32>
    %39 = vector.multi_reduction <add>, %38, %cst_14 [1, 2] : vector<1x8x1xf32> to vector<1xf32>
    %40 = vector.shape_cast %39 : vector<1xf32> to vector<1x1x1xf32>
    %41 = vector.extract %40[0, 0, 0] : f32 from vector<1x1x1xf32>
    %42 = arith.addf %37, %41 : f32
    %43 = tpu.iota {dimensions = array<i32: 2>} : vector<1x1x128xi32>
    %c0_15 = arith.constant 0 : index
    %c0_16 = arith.constant 0 : index
    %c0_17 = arith.constant 0 : index
    %44 = vector.load %arg5[%c0_15, %c0_16, %c0_17] : memref<1x1x128xf32, #tpu.memory_space<vmem>>, vector<1x1x128xf32>
    %c128_i32 = arith.constant 128 : i32
    %c0_i32_18 = arith.constant 0 : i32
    %45 = arith.cmpi eq, %c128_i32, %c0_i32_18 : i32
    %c1_i32_19 = arith.constant 1 : i32
    %46 = arith.select %45, %c1_i32_19, %c128_i32 : i32
    %47 = arith.remsi %arg1, %46 : i32
    %c0_i32_20 = arith.constant 0 : i32
    %48 = arith.cmpi ne, %47, %c0_i32_20 : i32
    %c0_i32_21 = arith.constant 0 : i32
    %49 = arith.cmpi slt, %47, %c0_i32_21 : i32
    %c0_i32_22 = arith.constant 0 : i32
    %50 = arith.cmpi slt, %46, %c0_i32_22 : i32
    %51 = arith.xori %49, %50 : i1
    %52 = arith.andi %51, %48 : i1
    %53 = arith.addi %47, %46 : i32
    %54 = arith.select %52, %53, %47 : i32
    %55 = vector.broadcast %54 : i32 to vector<1x1x128xi32>
    %56 = arith.cmpi eq, %43, %55 : vector<1x1x128xi32>
    %cst_23 = arith.constant 0.000000e+00 : f32
    %57 = vector.broadcast %42 : f32 to vector<1x1x128xf32>
    %58 = vector.broadcast %cst_23 : f32 to vector<1x1x128xf32>
    %59 = arith.select %56, %57, %58 : vector<1x1x128xi1>, vector<1x1x128xf32>
    %60 = arith.addf %44, %59 : vector<1x1x128xf32>
    %c0_24 = arith.constant 0 : index
    %c0_25 = arith.constant 0 : index
    %c0_26 = arith.constant 0 : index
    %61 = vector.load %arg5[%c0_24, %c0_25, %c0_26] : memref<1x1x128xf32, #tpu.memory_space<vmem>>, vector<1x1x128xf32>
    tpu.vector_store %arg5[%c0_24, %c0_25, %c0_26], %60 {strides = array<i32>} : memref<1x1x128xf32, #tpu.memory_space<vmem>>, vector<1x1x128xf32>,
    return
  }
  func.func @transform_0(%arg0: i32, %arg1: i32) -> (i32, i32) {
    %c1_i32 = arith.constant 1 : i32
    %0 = arith.muli %arg0, %c1_i32 : i32
    %1 = arith.addi %0, %arg1 : i32
    %c0_i32 = arith.constant 0 : i32
    %2 = arith.minsi %1, %c0_i32 : i32
    %c0_i32_0 = arith.constant 0 : i32
    %c0_i32_1 = arith.constant 0 : i32
    return %2, %c0_i32_0 : i32, i32
  }
  func.func @transform_1(%arg0: i32, %arg1: i32) -> (i32, i32) {
    %c1_i32 = arith.constant 1 : i32
    %0 = arith.muli %arg0, %c1_i32 : i32
    %1 = arith.addi %0, %arg1 : i32
    %c0_i32 = arith.constant 0 : i32
    %2 = arith.minsi %1, %c0_i32 : i32
    %c0_i32_0 = arith.constant 0 : i32
    %c0_i32_1 = arith.constant 0 : i32
    return %2, %c0_i32_0 : i32, i32
  }
  func.func @transform_2(%arg0: i32, %arg1: i32) -> (i32, i32) {
    %c1_i32 = arith.constant 1 : i32
    %0 = arith.muli %arg0, %c1_i32 : i32
    %1 = arith.addi %0, %arg1 : i32
    %c0_i32 = arith.constant 0 : i32
    %2 = arith.minsi %1, %c0_i32 : i32
    %c0_i32_0 = arith.constant 0 : i32
    %c0_i32_1 = arith.constant 0 : i32
    return %c0_i32_0, %2 : i32, i32
  }
  func.func @transform_3(%arg0: i32, %arg1: i32) -> (i32, i32, i32) {
    %c0_i32 = arith.constant 0 : i32
    %c0_i32_0 = arith.constant 0 : i32
    %c0_i32_1 = arith.constant 0 : i32
    return %arg0, %c0_i32, %c0_i32_0 : i32, i32, i32
  }
}

</mosaic_0001>

<bundles_post_ra>
// kernel: tpu_custom_call.1
= control target key start
LH: loop header
LB: loop body
LE: loop exit
PB: predicated region body
PF: predicated region fallthrough
CT: control target
= control target key end

     0   :  { %8 = vsyncpa [#allocation3], 0  ;;  %s329_s0 = inlined_call_operand.hbm [shape: f32[8,32], index: 0, kind: input, shape index: {}]   ;;  %s330_s1 = inlined_call_operand.hbm [shape: f32[8,32], index: 1, kind: input, shape index: {}]   ;;  %s331_s2 = inlined_call_operand.vmem [shape: f32[1,8], index: 2, kind: input, shape index: {}]   ;;  %s332_s3 = inlined_call_operand.hbm [shape: f32[1,1,128], index: 3, kind: output, shape index: {}]  }
   0x1   :  { %9 = vsyncpa [#allocation6], 0 }
   0x2   :  { %10 = vsyncpa [#allocation4], 0  ;;  %s21_s14 = sshll.u32 %s329_s0, 4  ;;  %s293_s15 = smov [#allocation2]   ;;  %s22_s14 = int_to_ptr.hbm [resolvable:$true] %s21_s14 }
   0x3   :  { %s23_s16 = sshll.u32 %s293_s15, 4  ;;  %s37_s19 = sshll.u32 %s330_s1, 4  ;;  %s24_s16 = int_to_ptr.vmem [resolvable:$true] %s23_s16  ;;  %s38_s19 = int_to_ptr.hbm [resolvable:$true] %s37_s19 }
   0x4   :  { %26 = dma.hbm_to_vmem [thread:$0]  %s22_s14, 128, %s24_s16, [#allocation3]  }
   0x5   :  { %s294_s20 = smov [#allocation5]  }
   0x6   :  { %s39_s21 = sshll.u32 %s294_s20, 4  ;;  %s40_s21 = int_to_ptr.vmem [resolvable:$true] %s39_s21 }
   0x7   :  { %42 = dma.hbm_to_vmem [thread:$0]  %s38_s19, 128, %s40_s21, [#allocation6]  }
   0x8   :  { %287 = dma.done.wait [#allocation3], 128  }
   0x9   :  { %288 = vsyncadd [#allocation3], 4294967168 }
   0xa   :  { %289 = dma.done.wait [#allocation6], 128  }
   0xb   :  { %290 = vsyncadd [#allocation6], 4294967168  ;;  %v295_v0 = vmov 0.0   ;;  %v88_v1 = vld [vmem:[#allocation2] sm:$0xff]  ;;  %v89_v2 = vld [vmem:[#allocation5] sm:$0xff]  ;;  %vm93_vm0 = vcmask 261120   ;;  %v121_v13 = vlaneseq }
   0xc   :  { %87 = vst [vmem:[#allocation7] sm:$0x1] %v295_v0  ;;  %v91_v3 = vsub.f32 %v88_v1, %v89_v2  ;;  %vm152_vm3 = vcmask 7168   ;;  %v90_v21 = vld [vmem:[%s331_s2] sm:$0x1]  ;;  %vm127_vm5 = vcmask 64512  }
   0xd   :  { %v122_v18 = vand.u32 127, %v121_v13  ;;  %s296_s24 = smov [#allocation7]   ;;  %s186_s28 = sshll.u32 %s332_s3, 4  ;;  %s187_s28 = int_to_ptr.hbm [resolvable:$true] %s186_s28 }
   0xe   :  { %v92_v4 = vmul.f32 %v91_v3, %v91_v3  ;;  %s184_s25 = sshll.u32 %s296_s24, 4  ;;  %s185_s25 = int_to_ptr.vmem [resolvable:$true] %s184_s25 }
   0xf   :  { %vm124_vm4 = vcmp.lt.s32.totalorder %v122_v18, 8  ;;  %vm174_vm6 = vcmp.eq.s32.totalorder %v122_v18, 0 }
  0x10   :  { %v94_v5 = vsel %vm93_vm0, %v92_v4, 0.0  ;;  %v125_v25 = vsel %vm124_vm4, %v90_v21, 0.0 }
  0x11   :  { %95 = vadd.xlane.f32.xlu0 %v94_v5 }
  0x13   :  { %v164_v34 = vld [vmem:[#allocation7] sm:$0x1] }
  0x84   :  { %v96_v6 = vpop.xlane.xlu0 %95 }
  0x85   :  { %213 = vrsqrt.f32 %v96_v6  ;;  %vm104_vm1 = vcmp.eq.f32.partialorder %v96_v6, inf  ;;  %v107_v15 = vand.u32 2147483648, %v96_v6  ;;  %vm106_vm2 = vcmp.eq.f32.partialorder %v96_v6, 0.0 }
  0x8b   :  { %v214_v7 = vpop.eup %213 }
  0x8c   :  { %v98_v8 = vmul.f32 %v214_v7, %v96_v6 }
  0x8e   :  { %v99_v9 = vmul.f32 %v214_v7, %v98_v8 }
  0x90   :  { %v100_v10 = vmul.f32 0.5, %v99_v9 }
  0x92   :  { %v101_v11 = vsub.f32 1.5, %v100_v10 }
  0x94   :  { %v102_v12 = vmul.f32 %v214_v7, %v101_v11 }
  0x96   :  { %v103_v14 = vmul.f32 %v102_v12, %v96_v6 }
  0x98   :  { %v105_v16 = vsel %vm104_vm1, %v96_v6, %v103_v14 }
  0x99   :  { %v108_v17 = vsel %vm106_vm2, %v107_v15, %v105_v16 }
  0x9a   :  { %v109_v19 = vsub.f32 5.0, %v108_v17 }
  0x9c   :  { %v110_v20 = vmax.f32 %v109_v19, 0.0 }
  0x9e   :  { %v111_v22 = vmul.f32 %v110_v20, %v110_v20 }
  0xa0   :  { %v153_v23 = vsel %vm152_vm3, %v111_v22, 0.0  ;;  %v126_v24 = vsub.f32 %v96_v6, %v111_v22 }
  0xa1   :  { %154 = vadd.xlane.f32.xlu0 %v153_v23 }
  0xa2   :  { %146 = vmatpush.msra.mxu0 %v126_v24 }
  0xa3   :  { %204 = vmatmul.msk.f32.vlgmr.msra.gmra.mxu0 %vm127_vm5, %v125_v25 }
 0x114   :  { %v155_v26 = vpop.xlane.xlu0 %154 }
 0x115   :  { %v156_v27 = vrot.slane %v155_v26, 4 }
 0x117   :  { %v157_v28 = vadd.f32 %v156_v27, %v155_v26 }
 0x119   :  { %v158_v29 = vrot.slane %v157_v28, 2 }
 0x11b   :  { %v159_v30 = vadd.f32 %v158_v29, %v157_v28 }
 0x11d   :  { %v160_v31 = vrot.slane %v159_v30, 1 }
 0x11f   :  { %v161_v32 = vadd.f32 %v160_v31, %v159_v30 }
 0x120   :  { %v148_v33 = vpop.f32.mrf.mxu0 }
 0x121   :  { %205 = vpush %v148_v33 }
 0x122   :  { %207 = vpush %v161_v32 }
 0x152   :  { %s206_s2 = spop %205 }
 0x153   :  { %s208_s22 = spop %207 }
 0x154   :  { %s163_s23 = sadd.f32 %s208_s22, %s206_s2 }
 0x156   :  { %v175_v35 = vstv %s163_s23 }
 0x157   :  { %v176_v36 = vsel %vm174_vm6, %v175_v35, 0.0 }
 0x158   :  { %v177_v37 = vadd.f32 %v176_v36, %v164_v34 }
 0x15a   :  { %178 = vst [vmem:[#allocation7] sm:$0x1] %v177_v37 }
 0x15b   :  { %189 = dma.vmem_to_hbm [thread:$0]  %s185_s25, 16, %s187_s28, [#allocation4]  }
 0x15c   :  { %291 = dma.done.wait [#allocation4], 16  }
 0x15d   :  { %292 = vsyncadd [#allocation4], 4294967280 }
 0x15e   :  { %194 = vsyncpa [#allocation3], 1 }
 0x15f   :  { %195 = vsyncpa [#allocation6], 1 }
 0x160   :  { %196 = vsyncpa [#allocation4], 1 }

</bundles_post_ra>
